<compile_context>
chip_gen: v5e
topology: v5e:2x2
jax: 0.10.0
libtpu: 0.0.40
codegen_flags: <defaults>
</compile_context>

<pallas_src>
import jax
import jax.numpy as jnp
from jax.experimental import pallas as pl
from jax.experimental.pallas import tpu as pltpu


def _round_up(x, m):
    return (x + m - 1) // m * m


def _vmem_budget():
    """~75% of this chip's VMEM; conservative 64 MiB (v7x) if query fails."""
    cap = 64 << 20
    try:
        cap = int(pltpu.get_tpu_info().vmem_capacity_bytes)
    except Exception:
        pass
    return max(32 << 20, int(cap * 0.75))


def _mlp_res_kernel(x_ref, w1_ref, b1_ref, w2_ref, b2_ref, w3_ref, b3_ref, o_ref):
    # MXU operands kept in the input dtype (bf16 path is ~2x f32 on v6e/v7x);
    # accumulate in f32 via preferred_element_type. Bias/ReLU/residual in f32
    # on the VPU, single down-cast at the store (one wide unmasked vst).
    x = x_ref[...]                                                     # (tm, Dp)
    h = jnp.dot(x, w1_ref[...], preferred_element_type=jnp.float32)   # (tm, Hp)
    h = jnp.maximum(h + b1_ref[...], 0.0).astype(x.dtype)
    h = jnp.dot(h, w2_ref[...], preferred_element_type=jnp.float32)   # (tm, Hp)
    h = jnp.maximum(h + b2_ref[...], 0.0).astype(x.dtype)
    out = jnp.dot(h, w3_ref[...], preferred_element_type=jnp.float32)  # (tm, Dp)
    out = out + b3_ref[...] + x.astype(jnp.float32)                    # residual
    o_ref[...] = out.astype(o_ref.dtype)


def _resident_spec(shape):
    """BlockSpec for an operand whose block never changes across the grid:
    single-buffer it (the default double buffer is a dead copy)."""
    try:
        return pl.BlockSpec(shape, lambda i: (0, 0), pipeline_mode=pl.Buffered(1))
    except TypeError:  # older BlockSpec without pipeline_mode kwarg
        return pl.BlockSpec(shape, lambda i: (0, 0))


def bottleneck_perceptron_3_layer_res(x, w1, b1, w2, b2, w3, b3, *, tm=None):
    """x: (..., D). Weights pre-transposed to (in, out):
    w1: (D, H), w2: (H, H), w3: (H, D); biases: (H,), (H,), (D,)."""
    orig_shape = x.shape
    D = orig_shape[-1]
    H = w1.shape[1]
    x2 = x.reshape(-1, D)
    N = x2.shape[0]
    dt = x2.dtype
    itemsize = jnp.dtype(dt).itemsize

    # Lane-dense feature dims (multiples of 128) keep every matmul column
    # block and every output store unmasked.
    Dp = _round_up(D, 128)
    Hp = _round_up(H, 128)
    n8 = _round_up(max(N, 1), 8)

    # --- VMEM-budget-driven row tile ------------------------------------
    budget = _vmem_budget()
    # Weights + biases resident once (single-buffered).
    w_bytes = (Dp * Hp + Hp * Hp + Hp * Dp) * itemsize + (2 * Hp + Dp) * 4
    # Per row: double-buffered x and out tiles (input dtype) + f32
    # intermediates / residual living in compiler scratch during compute.
    per_row = 2 * 2 * Dp * itemsize + (2 * Hp + 2 * Dp) * 4
    if tm is None:
        tm = 8
        for cand in (2048, 1536, 1024, 768, 512, 384, 256, 128, 64, 32, 16, 8):
            c = min(cand, n8)
            if w_bytes + c * per_row <= budget:
                tm = c
                break
    tm = max(8, min(_round_up(tm, 8), n8))
    # TODO(synk): for very large D/H where w_bytes alone approaches the budget,
    # tile the weight matrices over an extra K/N grid axis with an f32
    # accumulator instead of keeping all three fully resident.

    # --- Pad activations only when actually needed -----------------------
    # Padded H columns see zero weights/biases -> zero after ReLU -> no
    # contribution downstream; padded D columns / rows are sliced off.
    need_act_pad = (Dp != D) or (n8 != N)
    xr = jnp.pad(x2, ((0, n8 - N), (0, Dp - D))) if need_act_pad else x2
    Nr = xr.shape[0]

    # --- Pad/cast weights only when actually needed -----------------------
    # NOTE: for repeated inference, hoist this padding/casting to model init.
    w1c = w1.astype(dt)
    w2c = w2.astype(dt)
    w3c = w3.astype(dt)
    if (Dp != D) or (Hp != H):
        w1c = jnp.pad(w1c, ((0, Dp - D), (0, Hp - H)))
        w2c = jnp.pad(w2c, ((0, Hp - H), (0, Hp - H)))
        w3c = jnp.pad(w3c, ((0, Hp - H), (0, Dp - D)))
    # Biases in f32 (elementwise path is f32 on all chips incl. v5e), (1, dim)
    # so they broadcast over the row tile. Tiny, always rebuilt.
    b1p = jnp.pad(b1.astype(jnp.float32), (0, Hp - H)).reshape(1, Hp)
    b2p = jnp.pad(b2.astype(jnp.float32), (0, Hp - H)).reshape(1, Hp)
    b3p = jnp.pad(b3.astype(jnp.float32), (0, Dp - D)).reshape(1, Dp)

    grid = (pl.cdiv(Nr, tm),)  # partial last row block is masked by Pallas

    out = pl.pallas_call(
        _mlp_res_kernel,
        out_shape=jax.ShapeDtypeStruct((Nr, Dp), dt),
        grid_spec=pltpu.PrefetchScalarGridSpec(
            num_scalar_prefetch=0,
            grid=grid,
            in_specs=[
                pl.BlockSpec((tm, Dp), lambda i: (i, 0)),  # x row tile (pipelined)
                _resident_spec((Dp, Hp)),                  # W1
                _resident_spec((1, Hp)),                   # b1
                _resident_spec((Hp, Hp)),                  # W2
                _resident_spec((1, Hp)),                   # b2
                _resident_spec((Hp, Dp)),                  # W3
                _resident_spec((1, Dp)),                   # b3
            ],
            out_specs=pl.BlockSpec((tm, Dp), lambda i: (i, 0)),
        ),
        compiler_params=pltpu.CompilerParams(
            dimension_semantics=("parallel",),
            vmem_limit_bytes=budget,
        ),
    )(xr, w1c, b1p, w2c, b2p, w3c, b3p)

    if need_act_pad:
        out = out[:N, :D]
    return out.reshape(orig_shape)


def _init_linear(key, fan_in, fan_out, dtype=jnp.float32):
    """PyTorch-style init: U(-1/sqrt(fan_in), 1/sqrt(fan_in)).
    Weight returned already transposed to (fan_in, fan_out); bias (fan_out,)."""
    kw, kb = jax.random.split(key)
    bound = 1.0 / jnp.sqrt(jnp.asarray(fan_in, dtype))
    w = jax.random.uniform(kw, (fan_in, fan_out), dtype, -bound, bound)
    b = jax.random.uniform(kb, (fan_out,), dtype, -bound, bound)
    return w, b


def _ref_forward(x, w1, b1, w2, b2, w3, b3):
    h = jnp.maximum(x @ w1 + b1, 0.0)
    h = jnp.maximum(h @ w2 + b2, 0.0)
    return h @ w3 + b3 + x


if __name__ == "__main__":
    key = jax.random.PRNGKey(0)

    # Config A: leading dims + unaligned D (64 -> padded to 128), one row block.
    # Config B: aligned D=128 (no activation pad / slice), tm=32 forces a
    #           partial last row block (exercises the pl.cdiv masked path).
    configs = [
        ((2, 8, 64), None),   # in_dim = 64, H = 32
        ((40, 128), 32),      # in_dim = 128, H = 64
    ]

    for idx, (shape, tm) in enumerate(configs):
        D = shape[-1]
        H = D // 2
        k_x, k1, k2, k3 = jax.random.split(jax.random.fold_in(key, idx), 4)
        x = jax.random.normal(k_x, shape, jnp.float32)
        w1, b1 = _init_linear(k1, D, H)   # inp_fc
        w2, b2 = _init_linear(k2, H, H)   # hid_fc
        w3, b3 = _init_linear(k3, H, D)   # out_fc

        out = bottleneck_perceptron_3_layer_res(x, w1, b1, w2, b2, w3, b3, tm=tm)
        out = jax.block_until_ready(out)

        ref = _ref_forward(x, w1, b1, w2, b2, w3, b3)
        assert out.shape == x.shape
        assert jnp.allclose(out, ref, atol=1e-5, rtol=1e-5), (
            f"mismatch vs reference for config {shape}")

    print("KERNEL_OK")
</pallas_src>

<mosaic_0001>
module attributes {stable_mosaic.version = 11 : i64} {
  func.func @_mlp_res_kernel(%arg0: i32, %arg1: memref<16x128xf32, #tpu.memory_space<vmem>>, %arg2: memref<128x128xf32, #tpu.memory_space<vmem>>, %arg3: memref<1x128xf32, #tpu.memory_space<vmem>>, %arg4: memref<128x128xf32, #tpu.memory_space<vmem>>, %arg5: memref<1x128xf32, #tpu.memory_space<vmem>>, %arg6: memref<128x128xf32, #tpu.memory_space<vmem>>, %arg7: memref<1x128xf32, #tpu.memory_space<vmem>>, %arg8: memref<16x128xf32, #tpu.memory_space<vmem>>) attributes {dimension_semantics = [#tpu.dimension_semantics<parallel>], iteration_bounds = array<i64: 1>, scalar_prefetch = 0 : i64, scratch_operands = 0 : i64, tpu.core_type = #tpu.core_type<tc>, window_params = [{transform_indices = @transform_0, window_bounds = array<i64: 16, 128>}, {pipeline_mode = #tpu.pipeline_mode<synchronous>, transform_indices = @transform_1, window_bounds = array<i64: 128, 128>}, {pipeline_mode = #tpu.pipeline_mode<synchronous>, transform_indices = @transform_2, window_bounds = array<i64: 1, 128>}, {pipeline_mode = #tpu.pipeline_mode<synchronous>, transform_indices = @transform_3, window_bounds = array<i64: 128, 128>}, {pipeline_mode = #tpu.pipeline_mode<synchronous>, transform_indices = @transform_4, window_bounds = array<i64: 1, 128>}, {pipeline_mode = #tpu.pipeline_mode<synchronous>, transform_indices = @transform_5, window_bounds = array<i64: 128, 128>}, {pipeline_mode = #tpu.pipeline_mode<synchronous>, transform_indices = @transform_6, window_bounds = array<i64: 1, 128>}, {transform_indices = @transform_7, window_bounds = array<i64: 16, 128>}]} {
    %c0 = arith.constant 0 : index
    %c0_0 = arith.constant 0 : index
    %0 = vector.load %arg1[%c0, %c0_0] : memref<16x128xf32, #tpu.memory_space<vmem>>, vector<16x128xf32>
    %c0_1 = arith.constant 0 : index
    %c0_2 = arith.constant 0 : index
    %1 = vector.load %arg2[%c0_1, %c0_2] : memref<128x128xf32, #tpu.memory_space<vmem>>, vector<128x128xf32>
    %cst = arith.constant dense<0.000000e+00> : vector<16x128xf32>
    %2 = tpu.matmul %0, %1, %cst {dimension_numbers = #tpu.dot_dimension_numbers<[1], [0], [0], [1], [0, 0, 1, 1], [], []>} : vector<16x128xf32>, vector<128x128xf32>, vector<16x128xf32> -> vector<16x128xf32>
    %c0_3 = arith.constant 0 : index
    %c0_4 = arith.constant 0 : index
    %3 = vector.load %arg3[%c0_3, %c0_4] : memref<1x128xf32, #tpu.memory_space<vmem>>, vector<1x128xf32>
    %4 = vector.broadcast %3 : vector<1x128xf32> to vector<16x128xf32>
    %5 = arith.addf %2, %4 : vector<16x128xf32>
    %cst_5 = arith.constant 0.000000e+00 : f32
    %6 = vector.broadcast %cst_5 : f32 to vector<16x128xf32>
    %7 = arith.maximumf %5, %6 : vector<16x128xf32>
    %c0_6 = arith.constant 0 : index
    %c0_7 = arith.constant 0 : index
    %8 = vector.load %arg4[%c0_6, %c0_7] : memref<128x128xf32, #tpu.memory_space<vmem>>, vector<128x128xf32>
    %cst_8 = arith.constant dense<0.000000e+00> : vector<16x128xf32>
    %9 = tpu.matmul %7, %8, %cst_8 {dimension_numbers = #tpu.dot_dimension_numbers<[1], [0], [0], [1], [0, 0, 1, 1], [], []>} : vector<16x128xf32>, vector<128x128xf32>, vector<16x128xf32> -> vector<16x128xf32>
    %c0_9 = arith.constant 0 : index
    %c0_10 = arith.constant 0 : index
    %10 = vector.load %arg5[%c0_9, %c0_10] : memref<1x128xf32, #tpu.memory_space<vmem>>, vector<1x128xf32>
    %11 = vector.broadcast %10 : vector<1x128xf32> to vector<16x128xf32>
    %12 = arith.addf %9, %11 : vector<16x128xf32>
    %cst_11 = arith.constant 0.000000e+00 : f32
    %13 = vector.broadcast %cst_11 : f32 to vector<16x128xf32>
    %14 = arith.maximumf %12, %13 : vector<16x128xf32>
    %c0_12 = arith.constant 0 : index
    %c0_13 = arith.constant 0 : index
    %15 = vector.load %arg6[%c0_12, %c0_13] : memref<128x128xf32, #tpu.memory_space<vmem>>, vector<128x128xf32>
    %cst_14 = arith.constant dense<0.000000e+00> : vector<16x128xf32>
    %16 = tpu.matmul %14, %15, %cst_14 {dimension_numbers = #tpu.dot_dimension_numbers<[1], [0], [0], [1], [0, 0, 1, 1], [], []>} : vector<16x128xf32>, vector<128x128xf32>, vector<16x128xf32> -> vector<16x128xf32>
    %c0_15 = arith.constant 0 : index
    %c0_16 = arith.constant 0 : index
    %17 = vector.load %arg7[%c0_15, %c0_16] : memref<1x128xf32, #tpu.memory_space<vmem>>, vector<1x128xf32>
    %18 = vector.broadcast %17 : vector<1x128xf32> to vector<16x128xf32>
    %19 = arith.addf %16, %18 : vector<16x128xf32>
    %20 = arith.addf %19, %0 : vector<16x128xf32>
    %c0_17 = arith.constant 0 : index
    %c0_18 = arith.constant 0 : index
    %21 = vector.load %arg8[%c0_17, %c0_18] : memref<16x128xf32, #tpu.memory_space<vmem>>, vector<16x128xf32>
    tpu.vector_store %arg8[%c0_17, %c0_18], %20 {strides = array<i32>} : memref<16x128xf32, #tpu.memory_space<vmem>>, vector<16x128xf32>,
    return
  }
  func.func @transform_0(%arg0: i32) -> (i32, i32) {
    %c0_i32 = arith.constant 0 : i32
    %c0_i32_0 = arith.constant 0 : i32
    return %arg0, %c0_i32 : i32, i32
  }
  func.func @transform_1(%arg0: i32) -> (i32, i32) {
    %c0_i32 = arith.constant 0 : i32
    %c0_i32_0 = arith.constant 0 : i32
    %c0_i32_1 = arith.constant 0 : i32
    return %c0_i32, %c0_i32_0 : i32, i32
  }
  func.func @transform_2(%arg0: i32) -> (i32, i32) {
    %c0_i32 = arith.constant 0 : i32
    %c0_i32_0 = arith.constant 0 : i32
    %c0_i32_1 = arith.constant 0 : i32
    return %c0_i32, %c0_i32_0 : i32, i32
  }
  func.func @transform_3(%arg0: i32) -> (i32, i32) {
    %c0_i32 = arith.constant 0 : i32
    %c0_i32_0 = arith.constant 0 : i32
    %c0_i32_1 = arith.constant 0 : i32
    return %c0_i32, %c0_i32_0 : i32, i32
  }
  func.func @transform_4(%arg0: i32) -> (i32, i32) {
    %c0_i32 = arith.constant 0 : i32
    %c0_i32_0 = arith.constant 0 : i32
    %c0_i32_1 = arith.constant 0 : i32
    return %c0_i32, %c0_i32_0 : i32, i32
  }
  func.func @transform_5(%arg0: i32) -> (i32, i32) {
    %c0_i32 = arith.constant 0 : i32
    %c0_i32_0 = arith.constant 0 : i32
    %c0_i32_1 = arith.constant 0 : i32
    return %c0_i32, %c0_i32_0 : i32, i32
  }
  func.func @transform_6(%arg0: i32) -> (i32, i32) {
    %c0_i32 = arith.constant 0 : i32
    %c0_i32_0 = arith.constant 0 : i32
    %c0_i32_1 = arith.constant 0 : i32
    return %c0_i32, %c0_i32_0 : i32, i32
  }
  func.func @transform_7(%arg0: i32) -> (i32, i32) {
    %c0_i32 = arith.constant 0 : i32
    %c0_i32_0 = arith.constant 0 : i32
    return %arg0, %c0_i32 : i32, i32
  }
}

</mosaic_0001>

<bundles_post_ra>
// kernel: tpu_custom_call.1
= control target key start
LH: loop header
LB: loop body
LE: loop exit
PB: predicated region body
PF: predicated region fallthrough
CT: control target
= control target key end

     0   :  { %12 = vsyncpa [#allocation3], 0  ;;  %s498_s0 = inlined_call_operand.hbm [shape: f32[16,128], index: 0, kind: input, shape index: {}]   ;;  %s499_s1 = inlined_call_operand.hbm [shape: f32[128,128], index: 1, kind: input, shape index: {}]   ;;  %s500_s2 = inlined_call_operand.vmem [shape: f32[1,128], index: 2, kind: input, shape index: {}]   ;;  %s501_s3 = inlined_call_operand.hbm [shape: f32[128,128], index: 3, kind: input, shape index: {}]   ;;  %s502_s4 = inlined_call_operand.vmem [shape: f32[1,128], index: 4, kind: input, shape index: {}]   ;;  %s503_s5 = inlined_call_operand.hbm [shape: f32[128,128], index: 5, kind: input, shape index: {}]   ;;  %s504_s6 = inlined_call_operand.vmem [shape: f32[1,128], index: 6, kind: input, shape index: {}]   ;;  %s505_s7 = inlined_call_operand.hbm [shape: f32[16,128], index: 7, kind: output, shape index: {}]  }
   0x1   :  { %13 = vsyncpa [#allocation6], 0 }
   0x2   :  { %14 = vsyncpa [#allocation9], 0 }
   0x3   :  { %15 = vsyncpa [#allocation4], 0  ;;  %s33_s26 = sshll.u32 %s499_s1, 4  ;;  %s404_s27 = smov [#allocation5]   ;;  %s34_s26 = int_to_ptr.hbm [resolvable:$true] %s33_s26 }
   0x4   :  { %s35_s28 = sshll.u32 %s404_s27, 4  ;;  %s20_s8 = sshll.u32 %s498_s0, 4  ;;  %s36_s28 = int_to_ptr.vmem [resolvable:$true] %s35_s28  ;;  %s21_s8 = int_to_ptr.hbm [resolvable:$true] %s20_s8 }
   0x5   :  { %s405_s9 = smov 128   ;;  %s406_s10 = smov 8  }
   0x6   :  { %41 = dma.hbm_to_vmem [thread:$0]  %s34_s26, 2048, %s36_s28, [#allocation6], %s405_s9, %s405_s9, %s406_s10  }
   0x7   :  { %s407_s11 = smov [#allocation2]   ;;  %s48_s1 = sshll.u32 %s501_s3, 4  ;;  %s49_s1 = int_to_ptr.hbm [resolvable:$true] %s48_s1 }
   0x8   :  { %s22_s12 = sshll.u32 %s407_s11, 4  ;;  %s63_s16 = sshll.u32 %s503_s5, 4  ;;  %s23_s12 = int_to_ptr.vmem [resolvable:$true] %s22_s12  ;;  %s64_s16 = int_to_ptr.hbm [resolvable:$true] %s63_s16 }
   0x9   :  { %28 = dma.hbm_to_vmem [thread:$0]  %s21_s8, 256, %s23_s12, [#allocation3], %s405_s9, %s405_s9, %s406_s10  }
   0xa   :  { %s408_s17 = smov [#allocation7]   ;;  %s409_s19 = smov [#allocation8]  }
   0xb   :  { %s50_s18 = sshll.u32 %s408_s17, 4  ;;  %s65_s3 = sshll.u32 %s409_s19, 4  ;;  %s51_s18 = int_to_ptr.vmem [resolvable:$true] %s50_s18  ;;  %s66_s3 = int_to_ptr.vmem [resolvable:$true] %s65_s3 }
   0xc   :  { %56 = dma.hbm_to_vmem [thread:$0]  %s49_s1, 2048, %s51_s18, [#allocation6], %s405_s9, %s405_s9, %s406_s10  }
   0xd   :  { %71 = dma.hbm_to_vmem [thread:$0]  %s64_s16, 2048, %s66_s3, [#allocation9], %s405_s9, %s405_s9, %s406_s10  }
   0xe   :  { %396 = dma.done.wait [#allocation3], 256  }
   0xf   :  { %397 = vsyncadd [#allocation3], 4294967040 }
  0x10   :  { %398 = dma.done.wait [#allocation6], 4096  }
  0x11   :  { %399 = vsyncadd [#allocation6], 4294963200 }
  0x12   :  { %400 = dma.done.wait [#allocation9], 2048  }
  0x13   :  { %401 = vsyncadd [#allocation9], 4294965248  ;;  %v107_v0 = vld [vmem:[#allocation5 + $0x78] sm:$0xff]  ;;  %v106_v1 = vld [vmem:[#allocation5 + $0x70] sm:$0xff]  ;;  %s410_s24 = smov [#allocation10]   ;;  %s235_s27 = sshll.u32 %s505_s7, 4  ;;  %s236_s27 = int_to_ptr.hbm [resolvable:$true] %s235_s27 }
  0x14   :  { %112 = vmatpush.msra.mxu0 %v107_v0  ;;  %250 = vmatpush.msra.mxu3 %v107_v0  ;;  %v105_v2 = vld [vmem:[#allocation5 + $0x68] sm:$0xff]  ;;  %v104_v3 = vld [vmem:[#allocation5 + $0x60] sm:$0xff]  ;;  %v103_v4 = vld [vmem:[#allocation5 + $0x58] sm:$0xff] }
  0x15   :  { %v152_v5 = vld [vmem:[#allocation7 + $0x78] sm:$0xff]  ;;  %v151_v6 = vld [vmem:[#allocation7 + $0x70] sm:$0xff]  ;;  %v150_v8 = vld [vmem:[#allocation7 + $0x68] sm:$0xff] }
  0x16   :  { %113 = vmatpush.msra.mxu0 %v106_v1  ;;  %251 = vmatpush.msra.mxu3 %v106_v1  ;;  %v102_v7 = vld [vmem:[#allocation5 + $0x50] sm:$0xff]  ;;  %v101_v9 = vld [vmem:[#allocation5 + $0x48] sm:$0xff]  ;;  %v149_v10 = vld [vmem:[#allocation7 + $0x60] sm:$0xff] }
  0x17   :  { %157 = vmatpush.msra.mxu1 %v152_v5  ;;  %v100_v11 = vld [vmem:[#allocation5 + $0x40] sm:$0xff]  ;;  %v148_v12 = vld [vmem:[#allocation7 + $0x58] sm:$0xff]  ;;  %v147_v14 = vld [vmem:[#allocation7 + $0x50] sm:$0xff] }
  0x18   :  { %114 = vmatpush.msra.mxu0 %v105_v2  ;;  %252 = vmatpush.msra.mxu3 %v105_v2  ;;  %v99_v13 = vld [vmem:[#allocation5 + $0x38] sm:$0xff]  ;;  %v98_v15 = vld [vmem:[#allocation5 + $0x30] sm:$0xff]  ;;  %v146_v16 = vld [vmem:[#allocation7 + $0x48] sm:$0xff] }
  0x19   :  { %158 = vmatpush.msra.mxu1 %v151_v6  ;;  %v97_v17 = vld [vmem:[#allocation5 + $0x28] sm:$0xff]  ;;  %v145_v18 = vld [vmem:[#allocation7 + $0x40] sm:$0xff]  ;;  %v144_v20 = vld [vmem:[#allocation7 + $0x38] sm:$0xff] }
  0x1a   :  { %115 = vmatpush.msra.mxu0 %v104_v3  ;;  %253 = vmatpush.msra.mxu3 %v104_v3  ;;  %v96_v19 = vld [vmem:[#allocation5 + $0x20] sm:$0xff]  ;;  %v95_v21 = vld [vmem:[#allocation5 + $0x18] sm:$0xff]  ;;  %v143_v22 = vld [vmem:[#allocation7 + $0x30] sm:$0xff] }
  0x1b   :  { %159 = vmatpush.msra.mxu1 %v150_v8  ;;  %v94_v23 = vld [vmem:[#allocation5 + $0x10] sm:$0xff]  ;;  %v142_v24 = vld [vmem:[#allocation7 + $0x28] sm:$0xff]  ;;  %v141_v26 = vld [vmem:[#allocation7 + $0x20] sm:$0xff] }
  0x1c   :  { %116 = vmatpush.msra.mxu0 %v103_v4  ;;  %254 = vmatpush.msra.mxu3 %v103_v4  ;;  %v93_v25 = vld [vmem:[#allocation5 + $0x8] sm:$0xff]  ;;  %v92_v27 = vld [vmem:[#allocation5] sm:$0xff]  ;;  %v475_v28 = vld [vmem:[#allocation2] sm:$0xff] }
  0x1d   :  { %160 = vmatpush.msra.mxu1 %v149_v10  ;;  %v477_v29 = vld [vmem:[#allocation2 + $0x8] sm:$0xff]  ;;  %v139_v31 = vld [vmem:[#allocation7 + $0x10] sm:$0xff]  ;;  %v138_v32 = vld [vmem:[#allocation7 + $0x8] sm:$0xff] }
  0x1e   :  { %117 = vmatpush.msra.mxu0 %v102_v7  ;;  %255 = vmatpush.msra.mxu3 %v102_v7  ;;  %v140_v30 = vld [vmem:[#allocation7 + $0x18] sm:$0xff]  ;;  %v137_v33 = vld [vmem:[#allocation7] sm:$0xff]  ;;  %v196_v35 = vld [vmem:[#allocation8 + $0x70] sm:$0xff] }
  0x1f   :  { %161 = vmatpush.msra.mxu1 %v148_v12  ;;  %v197_v34 = vld [vmem:[#allocation8 + $0x78] sm:$0xff]  ;;  %v195_v36 = vld [vmem:[#allocation8 + $0x68] sm:$0xff]  ;;  %v194_v37 = vld [vmem:[#allocation8 + $0x60] sm:$0xff] }
  0x20   :  { %118 = vmatpush.msra.mxu0 %v101_v9  ;;  %256 = vmatpush.msra.mxu3 %v101_v9  ;;  %v193_v38 = vld [vmem:[#allocation8 + $0x58] sm:$0xff]  ;;  %v192_v39 = vld [vmem:[#allocation8 + $0x50] sm:$0xff]  ;;  %v191_v40 = vld [vmem:[#allocation8 + $0x48] sm:$0xff] }
  0x21   :  { %162 = vmatpush.msra.mxu1 %v147_v14  ;;  %202 = vmatpush.msra.mxu2 %v197_v34  ;;  %v190_v41 = vld [vmem:[#allocation8 + $0x40] sm:$0xff]  ;;  %v189_v42 = vld [vmem:[#allocation8 + $0x38] sm:$0xff]  ;;  %v273_v43 = vld [vmem:[%s500_s2] ss:$0 sm:$0xff] }
  0x22   :  { %119 = vmatpush.msra.mxu0 %v100_v11  ;;  %257 = vmatpush.msra.mxu3 %v100_v11  ;;  %v188_v44 = vld [vmem:[#allocation8 + $0x30] sm:$0xff]  ;;  %v187_v45 = vld [vmem:[#allocation8 + $0x28] sm:$0xff]  ;;  %v186_v48 = vld [vmem:[#allocation8 + $0x20] sm:$0xff] }
  0x23   :  { %163 = vmatpush.msra.mxu1 %v146_v16  ;;  %203 = vmatpush.msra.mxu2 %v196_v35  ;;  %v185_v50 = vld [vmem:[#allocation8 + $0x18] sm:$0xff]  ;;  %v184_v54 = vld [vmem:[#allocation8 + $0x10] sm:$0xff]  ;;  %v183_v55 = vld [vmem:[#allocation8 + $0x8] sm:$0xff] }
  0x24   :  { %120 = vmatpush.msra.mxu0 %v99_v13  ;;  %258 = vmatpush.msra.mxu3 %v99_v13  ;;  %v182_v56 = vld [vmem:[#allocation8] sm:$0xff]  ;;  %v274_v57 = vld [vmem:[%s502_s4] ss:$0 sm:$0xff]  ;;  %s233_s4 = sshll.u32 %s410_s24, 4  ;;  %s234_s4 = int_to_ptr.vmem [resolvable:$true] %s233_s4 }
  0x25   :  { %164 = vmatpush.msra.mxu1 %v145_v18  ;;  %204 = vmatpush.msra.mxu2 %v195_v36  ;;  %v275_v0 = vld [vmem:[%s504_s6] ss:$0 sm:$0xff] }
  0x26   :  { %121 = vmatpush.msra.mxu0 %v98_v15  ;;  %259 = vmatpush.msra.mxu3 %v98_v15 }
  0x27   :  { %165 = vmatpush.msra.mxu1 %v144_v20  ;;  %205 = vmatpush.msra.mxu2 %v194_v37 }
  0x28   :  { %122 = vmatpush.msra.mxu0 %v97_v17  ;;  %260 = vmatpush.msra.mxu3 %v97_v17 }
  0x29   :  { %166 = vmatpush.msra.mxu1 %v143_v22  ;;  %206 = vmatpush.msra.mxu2 %v193_v38 }
  0x2a   :  { %123 = vmatpush.msra.mxu0 %v96_v19  ;;  %261 = vmatpush.msra.mxu3 %v96_v19 }
  0x2b   :  { %167 = vmatpush.msra.mxu1 %v142_v24  ;;  %207 = vmatpush.msra.mxu2 %v192_v39 }
  0x2c   :  { %124 = vmatpush.msra.mxu0 %v95_v21  ;;  %262 = vmatpush.msra.mxu3 %v95_v21 }
  0x2d   :  { %168 = vmatpush.msra.mxu1 %v141_v26  ;;  %208 = vmatpush.msra.mxu2 %v191_v40 }
  0x2e   :  { %125 = vmatpush.msra.mxu0 %v94_v23  ;;  %263 = vmatpush.msra.mxu3 %v94_v23 }
  0x2f   :  { %169 = vmatpush.msra.mxu1 %v140_v30  ;;  %209 = vmatpush.msra.mxu2 %v190_v41 }
  0x30   :  { %126 = vmatpush.msra.mxu0 %v93_v25  ;;  %264 = vmatpush.msra.mxu3 %v93_v25 }
  0x31   :  { %170 = vmatpush.msra.mxu1 %v139_v31  ;;  %210 = vmatpush.msra.mxu2 %v189_v42 }
  0x32   :  { %127 = vmatpush.msra.mxu0 %v92_v27  ;;  %265 = vmatpush.msra.mxu3 %v92_v27 }
  0x33   :  { %128 = vmatmul.f32.vlgmr.msra.gmra.mxu0 %v475_v28  ;;  %131 = vmatmul.f32.vlgmr.msra.gmra.mxu3 %v477_v29 }
  0x34   :  { %171 = vmatpush.msra.mxu1 %v138_v32  ;;  %211 = vmatpush.msra.mxu2 %v188_v44 }
  0x36   :  { %172 = vmatpush.msra.mxu1 %v137_v33  ;;  %212 = vmatpush.msra.mxu2 %v187_v45 }
  0x38   :  { %213 = vmatpush.msra.mxu2 %v186_v48 }
  0x3a   :  { %214 = vmatpush.msra.mxu2 %v185_v50 }
  0x3c   :  { %215 = vmatpush.msra.mxu2 %v184_v54 }
  0x3e   :  { %216 = vmatpush.msra.mxu2 %v183_v55 }
  0x40   :  { %217 = vmatpush.msra.mxu2 %v182_v56 }
  0xb0   :  { %v129_v46 = vpop.f32.mrf.mxu0 }
  0xb1   :  { %v130_v47 = vadd.f32 %v273_v43, %v129_v46 }
  0xb3   :  { %v135_v49 = vmax.f32 %v130_v47, 0.0 }
  0xb5   :  { %173 = vmatmul.f32.vlgmr.msra.gmra.mxu1 %v135_v49 }
  0xb6   :  { %v132_v51 = vpop.f32.mrf.mxu3 }
  0xb7   :  { %v133_v52 = vadd.f32 %v273_v43, %v132_v51 }
  0xb9   :  { %v136_v53 = vmax.f32 %v133_v52, 0.0 }
  0xbd   :  { %176 = vmatmul.f32.gmra.mxu1 %v136_v53 }
 0x132   :  { %v174_v58 = vpop.f32.mrf.mxu1 }
 0x133   :  { %v175_v59 = vadd.f32 %v274_v57, %v174_v58 }
 0x135   :  { %v180_v60 = vmax.f32 %v175_v59, 0.0 }
 0x137   :  { %218 = vmatmul.f32.vlgmr.msra.gmra.mxu2 %v180_v60 }
 0x13a   :  { %v177_v61 = vpop.f32.mrf.mxu1 }
 0x13b   :  { %v178_v62 = vadd.f32 %v274_v57, %v177_v61 }
 0x13d   :  { %v181_v63 = vmax.f32 %v178_v62, 0.0 }
 0x13f   :  { %221 = vmatmul.f32.gmra.mxu2 %v181_v63 }
 0x1ba   :  { %v219_v1 = vpop.f32.mrf.mxu2 }
 0x1bb   :  { %v220_v2 = vadd.f32 %v275_v0, %v219_v1 }
 0x1bd   :  { %v225_v3 = vadd.f32 %v220_v2, %v475_v28 }
 0x1bf   :  { %227 = vst [vmem:[#allocation10] sm:$0xff] %v225_v3 }
 0x1c2   :  { %v222_v4 = vpop.f32.mrf.mxu2 }
 0x1c3   :  { %v223_v5 = vadd.f32 %v275_v0, %v222_v4 }
 0x1c5   :  { %v226_v6 = vadd.f32 %v223_v5, %v477_v29 }
 0x1c7   :  { %228 = vst [vmem:[#allocation10 + $0x8] sm:$0xff] %v226_v6 }
 0x1c8   :  { %241 = dma.vmem_to_hbm [thread:$0]  %s234_s4, 256, %s236_s27, [#allocation4], %s405_s9, %s405_s9, %s406_s10  }
 0x1c9   :  { %402 = dma.done.wait [#allocation4], 256  }
 0x1ca   :  { %403 = vsyncadd [#allocation4], 4294967040 }
 0x1cb   :  { %246 = vsyncpa [#allocation3], 1 }
 0x1cc   :  { %247 = vsyncpa [#allocation6], 1 }
 0x1cd   :  { %248 = vsyncpa [#allocation9], 1 }
 0x1ce   :  { %249 = vsyncpa [#allocation4], 1 }

</bundles_post_ra>
